<compile_context>
chip_gen: v7x
topology: tpu7x:2x2x1
jax: 0.10.0
libtpu: 0.0.40
codegen_flags: <defaults>
</compile_context>

<pallas_src>
import functools
import math

import jax
import jax.numpy as jnp
from jax.experimental import pallas as pl
from jax.experimental.pallas import tpu as pltpu


# ----------------------------------------------------------------------------
# Kernel bodies
# ----------------------------------------------------------------------------
def _ln_epilogue(y, g_ref, beta_ref, eps, out_dtype):
    """One-pass LayerNorm over the last axis of f32 `y` (biased variance, torch LN)."""
    h = y.shape[-1]
    inv_h = jnp.float32(1.0 / h)
    s1 = jnp.sum(y, axis=-1, keepdims=True)
    s2 = jnp.sum(y * y, axis=-1, keepdims=True)
    mean = s1 * inv_h
    var = jnp.maximum(s2 * inv_h - mean * mean, 0.0)   # guard tiny negative from cancellation
    y = (y - mean) * jax.lax.rsqrt(var + eps)
    y = y * g_ref[...].astype(jnp.float32) + beta_ref[...].astype(jnp.float32)
    return y.astype(out_dtype)


def _fused_kernel_single_k(eps, x_ref, w_ref, b_ref, res_ref, g_ref, beta_ref, o_ref):
    """Weight-resident path: one MXU pass over full K, then bias+residual+LN."""
    y = jnp.dot(x_ref[...], w_ref[...], preferred_element_type=jnp.float32)
    y = y + b_ref[...].astype(jnp.float32) + res_ref[...].astype(jnp.float32)
    o_ref[...] = _ln_epilogue(y, g_ref, beta_ref, eps, o_ref.dtype)


def _fused_kernel_ktiled(eps, x_ref, w_ref, b_ref, res_ref, g_ref, beta_ref,
                         o_ref, acc_ref):
    """K-tiled path: f32 VMEM accumulator, bias folded into the k==0 write."""
    k = pl.program_id(1)
    part = jnp.dot(x_ref[...], w_ref[...], preferred_element_type=jnp.float32)

    @pl.when(k == 0)
    def _():
        acc_ref[...] = part + b_ref[...].astype(jnp.float32)

    @pl.when(k > 0)
    def _():
        acc_ref[...] += part

    @pl.when(k == pl.num_programs(1) - 1)
    def _():
        y = acc_ref[...] + res_ref[...].astype(jnp.float32)
        o_ref[...] = _ln_epilogue(y, g_ref, beta_ref, eps, o_ref.dtype)


# ----------------------------------------------------------------------------
# Tiling / VMEM budget selection
# ----------------------------------------------------------------------------
def _round_up(x, m):
    return ((x + m - 1) // m) * m


def _vmem_budget_bytes():
    """Generation-aware scoped-VMEM budget: ~75% of capacity, capped at 100 MiB.

    v7x (64 MiB/TC) -> ~48 MiB; v5e/v6e (128 MiB) -> ~96 MiB.
    """
    cap = 128 * 1024 * 1024
    try:
        info = pltpu.get_tpu_info()
        for name in ("vmem_capacity_bytes", "vmem_size_bytes", "vmem_bytes"):
            v = getattr(info, name, None)
            if v:
                cap = int(v)
                break
    except Exception:
        pass
    return int(min(cap * 3 // 4, 100 * 1024 * 1024))


def _vmem_usage(tm, tk, H, nk, x_b, w_b, res_b, out_b):
    u = 2 * tm * tk * x_b            # activation stream (double-buffered)
    u += 2 * tk * H * w_b            # weight stream
    u += 2 * tm * H * res_b          # residual
    u += 2 * tm * H * out_b          # output
    u += 2 * 3 * max(H, 128) * 4     # bias / gamma / beta
    if nk > 1:
        u += tm * H * 4              # f32 accumulator scratch
    return u


def _select_tiles(R, K, H, x_b, w_b, res_b, out_b, budget):
    """Largest row tile first (weight re-streaming ~ R/tm), then full-K / large K tiles."""
    row_extent = max(8, _round_up(R, 16))   # 16 keeps bf16 sublane packing happy
    cands = {t for t in (1024, 512, 256, 128) if t <= row_extent}
    if row_extent <= 1024:
        cands.add(row_extent)
    tm_cands = sorted(cands, reverse=True)

    # Full K first (resident weight, no accumulator loop), then large divisors.
    tk_cands = [K] + [t for t in (2048, 1024, 512, 256, 128) if t < K and K % t == 0]

    # NOTE(megacore/v7x): if R_pad // tm == 1 the second TensorCore idles; for
    # compute-bound configs on v7x prefer a smaller tm so >=2 row tiles exist.
    for tm in tm_cands:
        for tk in tk_cands:
            nk = max(1, K // tk)
            if _vmem_usage(tm, tk, H, nk, x_b, w_b, res_b, out_b) <= budget:
                return tm, tk
    return tm_cands[-1], tk_cands[-1]


# ----------------------------------------------------------------------------
# Fused op wrapper
# ----------------------------------------------------------------------------
def fused_dense_residual_layernorm(x, residual, w, b, gamma, beta, eps,
                                   *, row_tile=None, k_tile=None):
    """LayerNorm(x @ w + b + residual).

    x:        (R, K)   rows = batch * seq
    residual: (R, H)
    w:        (K, H),  b / gamma / beta: (H,)
    """
    R, K = x.shape
    Kw, H = w.shape
    assert Kw == K and residual.shape == (R, H)
    out_dtype = residual.dtype

    budget = _vmem_budget_bytes()
    tm_auto, tk_auto = _select_tiles(
        R, K, H,
        jnp.dtype(x.dtype).itemsize, jnp.dtype(w.dtype).itemsize,
        jnp.dtype(residual.dtype).itemsize, jnp.dtype(out_dtype).itemsize,
        budget)
    tm = int(row_tile) if row_tile else tm_auto
    tk = int(k_tile) if k_tile else tk_auto
    if tk < K and K % tk != 0:
        tk = K          # never leave the reduction axis ragged
    tm = max(8, _round_up(tm, 8))

    nr = pl.cdiv(R, tm)             # ragged last row block handled by Pallas masking
    b2 = b.reshape(1, H).astype(jnp.float32)
    g2 = gamma.reshape(1, H).astype(jnp.float32)
    beta2 = beta.reshape(1, H).astype(jnp.float32)

    if tk >= K:
        # ---- weight-resident path: grid over rows only ----
        kernel = functools.partial(_fused_kernel_single_k, eps)
        grid = (nr,)
        in_specs = [
            pl.BlockSpec((tm, K), lambda i: (i, 0)),    # activations (streamed)
            pl.BlockSpec((K, H), lambda i: (0, 0)),     # dense weight (resident)
            pl.BlockSpec((1, H), lambda i: (0, 0)),     # bias (resident)
            pl.BlockSpec((tm, H), lambda i: (i, 0)),    # residual
            pl.BlockSpec((1, H), lambda i: (0, 0)),     # LN gamma
            pl.BlockSpec((1, H), lambda i: (0, 0)),     # LN beta
        ]
        out_specs = pl.BlockSpec((tm, H), lambda i: (i, 0))
        scratch = []
        dims = ("parallel",)
    else:
        # ---- K-tiled path: reduction axis last, f32 accumulator ----
        nk = K // tk
        kernel = functools.partial(_fused_kernel_ktiled, eps)
        grid = (nr, nk)
        in_specs = [
            pl.BlockSpec((tm, tk), lambda i, k: (i, k)),   # activations
            pl.BlockSpec((tk, H), lambda i, k: (k, 0)),    # weight (streamed over K)
            pl.BlockSpec((1, H), lambda i, k: (0, 0)),     # bias
            pl.BlockSpec((tm, H), lambda i, k: (i, 0)),    # residual (once per row tile)
            pl.BlockSpec((1, H), lambda i, k: (0, 0)),     # gamma
            pl.BlockSpec((1, H), lambda i, k: (0, 0)),     # beta
        ]
        out_specs = pl.BlockSpec((tm, H), lambda i, k: (i, 0))
        scratch = [pltpu.VMEM((tm, H), jnp.float32)]
        dims = ("parallel", "arbitrary")

    return pl.pallas_call(
        kernel,
        out_shape=jax.ShapeDtypeStruct((R, H), out_dtype),
        grid_spec=pltpu.PrefetchScalarGridSpec(
            num_scalar_prefetch=0,
            grid=grid,
            in_specs=in_specs,
            out_specs=out_specs,
            scratch_shapes=scratch,
        ),
        compiler_params=pltpu.CompilerParams(
            dimension_semantics=dims,
            vmem_limit_bytes=budget,
        ),
    )(x, w, b2, residual, g2, beta2)


# ----------------------------------------------------------------------------
# Module wrapper
# ----------------------------------------------------------------------------
class DebertaV2OutputPallas:
    """JAX/Pallas equivalent of DebertaV2Output.forward (eval mode, no adapter)."""

    def __init__(self, key, *, intermediate_size, hidden_size,
                 layer_norm_eps=1e-7, hidden_dropout_prob=0.0, ds_factor=None,
                 param_dtype=jnp.float32):
        self.eps = float(layer_norm_eps)
        self.hidden_size = hidden_size
        self.intermediate_size = intermediate_size
        self.hidden_dropout_prob = hidden_dropout_prob
        self.ds_factor = ds_factor
        if ds_factor:
            # TODO(synk): Adapter module (ds_factor path) is not defined in the spec;
            # only the ds_factor=None path is implemented.
            raise NotImplementedError("Adapter (ds_factor) path not provided in spec")

        k0, k1 = jax.random.split(key)
        bound = 1.0 / math.sqrt(intermediate_size)
        # Matmul operands stored in param_dtype (use bfloat16 for best MXU/HBM perf);
        # bias / LN params stay f32 (epilogue math is f32 regardless).
        self.dense_w = jax.random.uniform(
            k0, (intermediate_size, hidden_size), jnp.float32, -bound, bound
        ).astype(param_dtype)
        self.dense_b = jax.random.uniform(
            k1, (hidden_size,), jnp.float32, -bound, bound)
        self.ln_gamma = jnp.ones((hidden_size,), jnp.float32)
        self.ln_beta = jnp.zeros((hidden_size,), jnp.float32)

    def __call__(self, hidden_states, input_tensor):
        # TODO(synk): StableDropout is identity in eval mode; training-time masked
        # dropout is not implemented here.
        B, S, I = hidden_states.shape
        H = self.hidden_size
        x = hidden_states.reshape(B * S, I)
        if x.dtype != self.dense_w.dtype:
            x = x.astype(self.dense_w.dtype)   # match MXU operand dtype (bf16 fast path)
        res = input_tensor.reshape(B * S, H)
        out = fused_dense_residual_layernorm(
            x, res, self.dense_w, self.dense_b, self.ln_gamma, self.ln_beta, self.eps)
        return out.reshape(B, S, H)


# ----------------------------------------------------------------------------
# Pure-JAX reference for validation (all math in f32)
# ----------------------------------------------------------------------------
def _reference_rows(x, res, w, b, gamma, beta, eps):
    x = x.astype(jnp.float32)
    res = res.astype(jnp.float32)
    w = w.astype(jnp.float32)
    y = jnp.dot(x, w, precision=jax.lax.Precision.HIGHEST)
    y = y + b.astype(jnp.float32) + res
    mean = jnp.mean(y, axis=-1, keepdims=True)
    var = jnp.mean(jnp.square(y - mean), axis=-1, keepdims=True)   # biased (torch LN)
    y = (y - mean) / jnp.sqrt(var + eps)
    return y * gamma.astype(jnp.float32) + beta.astype(jnp.float32)


def _reference(mod, hidden_states, input_tensor):
    B, S, _ = hidden_states.shape
    out = _reference_rows(hidden_states.reshape(B * S, -1),
                          input_tensor.reshape(B * S, -1),
                          mod.dense_w, mod.dense_b, mod.ln_gamma, mod.ln_beta, mod.eps)
    return out.reshape(B, S, -1)


if __name__ == "__main__":
    key = jax.random.PRNGKey(0)
    ks = jax.random.split(key, 12)

    # ---- Case 1: f32, small shapes consistent with the module -------------
    B, S, H, I = 2, 8, 32, 64
    mod = DebertaV2OutputPallas(ks[0], intermediate_size=I, hidden_size=H,
                                layer_norm_eps=1e-7)
    hs = jax.random.normal(ks[1], (B, S, I), jnp.float32)
    res = jax.random.normal(ks[2], (B, S, H), jnp.float32)
    out = jax.block_until_ready(mod(hs, res))
    ref = _reference(mod, hs, res)
    assert out.shape == (B, S, H)
    err = float(jnp.max(jnp.abs(out.astype(jnp.float32) - ref)))
    assert err < 1e-4, err

    # ---- Case 2: ragged rows (B*S = 10), exercises Pallas partial-block path
    hs2 = jax.random.normal(ks[3], (2, 5, I), jnp.float32)
    res2 = jax.random.normal(ks[4], (2, 5, H), jnp.float32)
    out2 = jax.block_until_ready(mod(hs2, res2))
    ref2 = _reference(mod, hs2, res2)
    assert out2.shape == (2, 5, H)
    err2 = float(jnp.max(jnp.abs(out2.astype(jnp.float32) - ref2)))
    assert err2 < 1e-4, err2

    # ---- Case 3: bf16 params / activations (bf16 MXU, f32 accumulation) ---
    mod_bf = DebertaV2OutputPallas(ks[5], intermediate_size=I, hidden_size=H,
                                   layer_norm_eps=1e-7, param_dtype=jnp.bfloat16)
    hs3 = jax.random.normal(ks[6], (B, S, I), jnp.bfloat16)
    res3 = jax.random.normal(ks[7], (B, S, H), jnp.bfloat16)
    out3 = jax.block_until_ready(mod_bf(hs3, res3))
    ref3 = _reference(mod_bf, hs3, res3)
    err3 = float(jnp.max(jnp.abs(out3.astype(jnp.float32) - ref3)))
    assert err3 < 6e-2, err3

    # ---- Case 4: force the K-tiled accumulator path (small shapes) --------
    R4, K4, H4 = 64, 256, 128
    x4 = jax.random.normal(ks[8], (R4, K4), jnp.float32) * 0.5
    res4 = jax.random.normal(ks[9], (R4, H4), jnp.float32)
    w4 = jax.random.normal(ks[10], (K4, H4), jnp.float32) * 0.05
    b4 = jax.random.normal(ks[11], (H4,), jnp.float32) * 0.1
    g4 = jnp.ones((H4,), jnp.float32)
    be4 = jnp.zeros((H4,), jnp.float32)
    out4 = jax.block_until_ready(
        fused_dense_residual_layernorm(x4, res4, w4, b4, g4, be4, 1e-7,
                                       row_tile=32, k_tile=128))
    ref4 = _reference_rows(x4, res4, w4, b4, g4, be4, 1e-7)
    err4 = float(jnp.max(jnp.abs(out4 - ref4)))
    assert err4 < 1e-4, err4

    print("KERNEL_OK")
</pallas_src>

<mosaic_0001>
module attributes {stable_mosaic.version = 11 : i64} {
  func.func @_fused_kernel_single_k(%arg0: i32, %arg1: memref<16x64xf32, #tpu.memory_space<vmem>>, %arg2: memref<64x32xf32, #tpu.memory_space<vmem>>, %arg3: memref<1x32xf32, #tpu.memory_space<vmem>>, %arg4: memref<16x32xf32, #tpu.memory_space<vmem>>, %arg5: memref<1x32xf32, #tpu.memory_space<vmem>>, %arg6: memref<1x32xf32, #tpu.memory_space<vmem>>, %arg7: memref<16x32xf32, #tpu.memory_space<vmem>>) attributes {dimension_semantics = [#tpu.dimension_semantics<parallel>], iteration_bounds = array<i64: 1>, scalar_prefetch = 0 : i64, scratch_operands = 0 : i64, tpu.core_type = #tpu.core_type<tc>, window_params = [{transform_indices = @transform_0, window_bounds = array<i64: 16, 64>}, {pipeline_mode = #tpu.pipeline_mode<synchronous>, transform_indices = @transform_1, window_bounds = array<i64: 64, 32>}, {pipeline_mode = #tpu.pipeline_mode<synchronous>, transform_indices = @transform_2, window_bounds = array<i64: 1, 32>}, {transform_indices = @transform_3, window_bounds = array<i64: 16, 32>}, {pipeline_mode = #tpu.pipeline_mode<synchronous>, transform_indices = @transform_4, window_bounds = array<i64: 1, 32>}, {pipeline_mode = #tpu.pipeline_mode<synchronous>, transform_indices = @transform_5, window_bounds = array<i64: 1, 32>}, {transform_indices = @transform_6, window_bounds = array<i64: 16, 32>}]} {
    %c0 = arith.constant 0 : index
    %c0_0 = arith.constant 0 : index
    %0 = vector.load %arg1[%c0, %c0_0] : memref<16x64xf32, #tpu.memory_space<vmem>>, vector<16x64xf32>
    %c0_1 = arith.constant 0 : index
    %c0_2 = arith.constant 0 : index
    %1 = vector.load %arg2[%c0_1, %c0_2] : memref<64x32xf32, #tpu.memory_space<vmem>>, vector<64x32xf32>
    %cst = arith.constant dense<0.000000e+00> : vector<16x32xf32>
    %2 = tpu.matmul %0, %1, %cst {dimension_numbers = #tpu.dot_dimension_numbers<[1], [0], [0], [1], [0, 0, 1, 1], [], []>} : vector<16x64xf32>, vector<64x32xf32>, vector<16x32xf32> -> vector<16x32xf32>
    %c0_3 = arith.constant 0 : index
    %c0_4 = arith.constant 0 : index
    %3 = vector.load %arg3[%c0_3, %c0_4] : memref<1x32xf32, #tpu.memory_space<vmem>>, vector<1x32xf32>
    %4 = vector.broadcast %3 : vector<1x32xf32> to vector<16x32xf32>
    %5 = arith.addf %2, %4 : vector<16x32xf32>
    %c0_5 = arith.constant 0 : index
    %c0_6 = arith.constant 0 : index
    %6 = vector.load %arg4[%c0_5, %c0_6] : memref<16x32xf32, #tpu.memory_space<vmem>>, vector<16x32xf32>
    %7 = arith.addf %5, %6 : vector<16x32xf32>
    %cst_7 = arith.constant dense<0.000000e+00> : vector<16xf32>
    %8 = vector.multi_reduction <add>, %7, %cst_7 [1] : vector<16x32xf32> to vector<16xf32>
    %9 = vector.shape_cast %8 : vector<16xf32> to vector<16x1xf32>
    %10 = arith.mulf %7, %7 : vector<16x32xf32>
    %cst_8 = arith.constant dense<0.000000e+00> : vector<16xf32>
    %11 = vector.multi_reduction <add>, %10, %cst_8 [1] : vector<16x32xf32> to vector<16xf32>
    %12 = vector.shape_cast %11 : vector<16xf32> to vector<16x1xf32>
    %cst_9 = arith.constant 3.125000e-02 : f32
    %13 = vector.broadcast %cst_9 : f32 to vector<16x1xf32>
    %14 = arith.mulf %9, %13 : vector<16x1xf32>
    %cst_10 = arith.constant 3.125000e-02 : f32
    %15 = vector.broadcast %cst_10 : f32 to vector<16x1xf32>
    %16 = arith.mulf %12, %15 : vector<16x1xf32>
    %17 = arith.mulf %14, %14 : vector<16x1xf32>
    %18 = arith.subf %16, %17 : vector<16x1xf32>
    %cst_11 = arith.constant 0.000000e+00 : f32
    %19 = vector.broadcast %cst_11 : f32 to vector<16x1xf32>
    %20 = arith.maximumf %18, %19 : vector<16x1xf32>
    %21 = vector.broadcast %14 : vector<16x1xf32> to vector<16x32xf32>
    %22 = arith.subf %7, %21 : vector<16x32xf32>
    %cst_12 = arith.constant 1.000000e-07 : f32
    %23 = vector.broadcast %cst_12 : f32 to vector<16x1xf32>
    %24 = arith.addf %20, %23 : vector<16x1xf32>
    %25 = math.rsqrt %24 : vector<16x1xf32>
    %26 = vector.broadcast %25 : vector<16x1xf32> to vector<16x32xf32>
    %27 = arith.mulf %22, %26 : vector<16x32xf32>
    %c0_13 = arith.constant 0 : index
    %c0_14 = arith.constant 0 : index
    %28 = vector.load %arg5[%c0_13, %c0_14] : memref<1x32xf32, #tpu.memory_space<vmem>>, vector<1x32xf32>
    %29 = vector.broadcast %28 : vector<1x32xf32> to vector<16x32xf32>
    %30 = arith.mulf %27, %29 : vector<16x32xf32>
    %c0_15 = arith.constant 0 : index
    %c0_16 = arith.constant 0 : index
    %31 = vector.load %arg6[%c0_15, %c0_16] : memref<1x32xf32, #tpu.memory_space<vmem>>, vector<1x32xf32>
    %32 = vector.broadcast %31 : vector<1x32xf32> to vector<16x32xf32>
    %33 = arith.addf %30, %32 : vector<16x32xf32>
    %c0_17 = arith.constant 0 : index
    %c0_18 = arith.constant 0 : index
    %34 = vector.load %arg7[%c0_17, %c0_18] : memref<16x32xf32, #tpu.memory_space<vmem>>, vector<16x32xf32>
    tpu.vector_store %arg7[%c0_17, %c0_18], %33 {strides = array<i32>} : memref<16x32xf32, #tpu.memory_space<vmem>>, vector<16x32xf32>,
    return
  }
  func.func @transform_0(%arg0: i32) -> (i32, i32) {
    %c0_i32 = arith.constant 0 : i32
    %c0_i32_0 = arith.constant 0 : i32
    return %arg0, %c0_i32 : i32, i32
  }
  func.func @transform_1(%arg0: i32) -> (i32, i32) {
    %c0_i32 = arith.constant 0 : i32
    %c0_i32_0 = arith.constant 0 : i32
    %c0_i32_1 = arith.constant 0 : i32
    return %c0_i32, %c0_i32_0 : i32, i32
  }
  func.func @transform_2(%arg0: i32) -> (i32, i32) {
    %c0_i32 = arith.constant 0 : i32
    %c0_i32_0 = arith.constant 0 : i32
    %c0_i32_1 = arith.constant 0 : i32
    return %c0_i32, %c0_i32_0 : i32, i32
  }
  func.func @transform_3(%arg0: i32) -> (i32, i32) {
    %c0_i32 = arith.constant 0 : i32
    %c0_i32_0 = arith.constant 0 : i32
    return %arg0, %c0_i32 : i32, i32
  }
  func.func @transform_4(%arg0: i32) -> (i32, i32) {
    %c0_i32 = arith.constant 0 : i32
    %c0_i32_0 = arith.constant 0 : i32
    %c0_i32_1 = arith.constant 0 : i32
    return %c0_i32, %c0_i32_0 : i32, i32
  }
  func.func @transform_5(%arg0: i32) -> (i32, i32) {
    %c0_i32 = arith.constant 0 : i32
    %c0_i32_0 = arith.constant 0 : i32
    %c0_i32_1 = arith.constant 0 : i32
    return %c0_i32, %c0_i32_0 : i32, i32
  }
  func.func @transform_6(%arg0: i32) -> (i32, i32) {
    %c0_i32 = arith.constant 0 : i32
    %c0_i32_0 = arith.constant 0 : i32
    return %arg0, %c0_i32 : i32, i32
  }
}

</mosaic_0001>

<bundles_post_ra>
// kernel: tpu_custom_call.1
= control target key start
LH: loop header
LB: loop body
LE: loop exit
PB: predicated region body
PF: predicated region fallthrough
CT: control target
= control target key end

     0   :  { %11 = vsyncpa [#allocation3], 0  ;;  %s658_s0 = inlined_call_operand.hbm [shape: f32[16,64], index: 0, kind: input, shape index: {}]   ;;  %s659_s1 = inlined_call_operand.hbm [shape: f32[64,32], index: 1, kind: input, shape index: {}]   ;;  %s660_s2 = inlined_call_operand.hbm [shape: f32[1,32], index: 2, kind: input, shape index: {}]   ;;  %s661_s3 = inlined_call_operand.hbm [shape: f32[16,32], index: 3, kind: input, shape index: {}]   ;;  %s662_s4 = inlined_call_operand.hbm [shape: f32[1,32], index: 4, kind: input, shape index: {}]   ;;  %s663_s5 = inlined_call_operand.hbm [shape: f32[1,32], index: 5, kind: input, shape index: {}]   ;;  %s664_s6 = inlined_call_operand.hbm [shape: f32[16,32], index: 6, kind: output, shape index: {}]  }
   0x1   :  { %12 = vsyncpa [#allocation6], 0 }
   0x2   :  { %13 = vsyncpa [#allocation9], 0 }
   0x3   :  { %14 = vsyncpa [#allocation12], 0 }
   0x4   :  { %15 = vsyncpa [#allocation4], 0  ;;  %s503_s21 = smov [#allocation5]   ;;  %s504_s23 = smov [#allocation8]  }
   0x5   :  { %s33_s22 = sshll.u32 %s503_s21, 4  ;;  %s55_s24 = sshll.u32 %s504_s23, 4  ;;  %s34_s22 = int_to_ptr.vmem [resolvable:$true] %s33_s22  ;;  %s547_s24 = int_to_ptr.vmem [resolvable:$true] %s55_s24 }
   0x6   :  { %s339_s27 = scalar_lea.hbm %s659_s1, 1024 }
   0x7   :  { %p340_p0 = scmp.ne.s32.totalorder %s659_s1, %s339_s27  ;;  %p343_p1 = scmp.lt.u32.totalorder %s339_s27, %s659_s1 }
   0x9   :  { %p345_p2 = pnand %p343_p1, %p340_p0 }
   0xb   :  { %348 = shalt.err (!%p345_p2)
}
   0xc   :  { %s349_s8 = scalar_lea.vmem %s34_s22, 1024  ;;  %p354_p4 = scmp.lt.s32.totalorder %s34_s22, %s34_s22 }
   0xd   :  { %p350_p3 = scmp.ne.s32.totalorder %s34_s22, %s349_s8  ;;  %p355_p5 = scmp.lt.s32.totalorder %s349_s8, %s349_s8 }
   0xf   :  { %p356_p6 = por %p355_p5, %p354_p4 }
  0x11   :  { %p357_p7 = pnand %p356_p6, %p350_p3 }
  0x13   :  { %360 = shalt.err (!%p357_p7)
}
  0x14   :  { %s505_s9 = smov 128   ;;  %s506_s10 = smov 8  }
  0x15   :  { %39 = dma.hbm_to_vmem [thread:$0]  %s659_s1, 1024, %s34_s22, [#allocation6], %s505_s9, %s505_s9, %s506_s10  }
  0x16   :  { %s361_s15 = scalar_lea.hbm %s661_s3, 256 }
  0x17   :  { %p362_p8 = scmp.ne.s32.totalorder %s661_s3, %s361_s15  ;;  %p365_p9 = scmp.lt.u32.totalorder %s361_s15, %s661_s3 }
  0x19   :  { %p367_p10 = pnand %p365_p9, %p362_p8 }
  0x1b   :  { %370 = shalt.err (!%p367_p10)
}
  0x1c   :  { %s371_s20 = scalar_lea.vmem %s547_s24, 256  ;;  %p376_p12 = scmp.lt.s32.totalorder %s547_s24, %s547_s24 }
  0x1d   :  { %p372_p11 = scmp.ne.s32.totalorder %s547_s24, %s371_s20  ;;  %p377_p13 = scmp.lt.s32.totalorder %s371_s20, %s371_s20 }
  0x1f   :  { %p378_p0 = por %p377_p13, %p376_p12 }
  0x21   :  { %p379_p1 = pnand %p378_p0, %p372_p11 }
  0x23   :  { %382 = shalt.err (!%p379_p1)
}
  0x24   :  { %61 = dma.hbm_to_vmem [thread:$0]  %s661_s3, 256, %s547_s24, [#allocation9], %s505_s9, %s505_s9, %s506_s10  }
  0x25   :  { %s507_s22 = smov [#allocation2]   ;;  %s508_s25 = smov [#allocation7]  }
  0x26   :  { %s21_s23 = sshll.u32 %s507_s22, 4  ;;  %s46_s26 = sshll.u32 %s508_s25, 4  ;;  %s22_s23 = int_to_ptr.vmem [resolvable:$true] %s21_s23  ;;  %s47_s26 = int_to_ptr.vmem [resolvable:$true] %s46_s26 }
  0x27   :  { %s383_s29 = scalar_lea.hbm %s658_s0, 256 }
  0x28   :  { %p384_p2 = scmp.ne.s32.totalorder %s658_s0, %s383_s29  ;;  %p387_p3 = scmp.lt.u32.totalorder %s383_s29, %s658_s0 }
  0x2a   :  { %p389_p4 = pnand %p387_p3, %p384_p2 }
  0x2c   :  { %392 = shalt.err (!%p389_p4)
}
  0x2d   :  { %s393_s3 = scalar_lea.vmem %s22_s23, 256  ;;  %p398_p6 = scmp.lt.s32.totalorder %s22_s23, %s22_s23 }
  0x2e   :  { %p394_p5 = scmp.ne.s32.totalorder %s22_s23, %s393_s3  ;;  %p399_p7 = scmp.lt.s32.totalorder %s393_s3, %s393_s3 }
  0x30   :  { %p400_p8 = por %p399_p7, %p398_p6 }
  0x32   :  { %p401_p9 = pnand %p400_p8, %p394_p5 }
  0x34   :  { %404 = shalt.err (!%p401_p9)
}
  0x35   :  { %27 = dma.hbm_to_vmem [thread:$0]  %s658_s0, 256, %s22_s23, [#allocation3], %s505_s9, %s505_s9, %s506_s10  }
  0x36   :  { %s405_s15 = scalar_lea.hbm %s660_s2, 16 }
  0x37   :  { %p406_p10 = scmp.ne.s32.totalorder %s660_s2, %s405_s15  ;;  %p409_p11 = scmp.lt.u32.totalorder %s405_s15, %s660_s2 }
  0x39   :  { %p411_p12 = pnand %p409_p11, %p406_p10 }
  0x3b   :  { %414 = shalt.err (!%p411_p12)
}
  0x3c   :  { %s415_s20 = scalar_lea.vmem %s47_s26, 16  ;;  %s419_s1 = scalar_lea.vmem %s47_s26, 32 }
  0x3d   :  { %p416_p13 = scmp.ne.s32.totalorder %s47_s26, %s415_s20  ;;  %p420_p0 = scmp.lt.s32.totalorder %s47_s26, %s47_s26 }
  0x3e   :  { %p421_p1 = scmp.lt.s32.totalorder %s419_s1, %s415_s20 }
  0x40   :  { %p422_p2 = por %p421_p1, %p420_p0 }
  0x42   :  { %p423_p3 = pnand %p422_p2, %p416_p13 }
  0x44   :  { %426 = shalt.err (!%p423_p3)
}
  0x45   :  { %49 = dma.hbm_to_vmem [thread:$0]  %s660_s2, 16, %s47_s26, [#allocation6]  }
  0x46   :  { %s509_s22 = smov [#allocation10]   ;;  %s510_s25 = smov [#allocation11]  }
  0x47   :  { %s68_s23 = sshll.u32 %s509_s22, 4  ;;  %s78_s27 = sshll.u32 %s510_s25, 4  ;;  %s69_s23 = int_to_ptr.vmem [resolvable:$true] %s68_s23  ;;  %s79_s27 = int_to_ptr.vmem [resolvable:$true] %s78_s27 }
  0x48   :  { %s427_s30 = scalar_lea.hbm %s662_s4, 16 }
  0x49   :  { %p428_p4 = scmp.ne.s32.totalorder %s662_s4, %s427_s30  ;;  %p431_p5 = scmp.lt.u32.totalorder %s427_s30, %s662_s4 }
  0x4b   :  { %p433_p6 = pnand %p431_p5, %p428_p4 }
  0x4d   :  { %436 = shalt.err (!%p433_p6)
}
  0x4e   :  { %s437_s2 = scalar_lea.vmem %s69_s23, 16  ;;  %s441_s26 = scalar_lea.vmem %s69_s23, 32 }
  0x4f   :  { %p438_p7 = scmp.ne.s32.totalorder %s69_s23, %s437_s2  ;;  %p442_p8 = scmp.lt.s32.totalorder %s69_s23, %s69_s23 }
  0x50   :  { %p443_p9 = scmp.lt.s32.totalorder %s441_s26, %s437_s2 }
  0x52   :  { %p444_p10 = por %p443_p9, %p442_p8 }
  0x54   :  { %p445_p11 = pnand %p444_p10, %p438_p7 }
  0x56   :  { %448 = shalt.err (!%p445_p11)
}
  0x57   :  { %71 = dma.hbm_to_vmem [thread:$0]  %s662_s4, 16, %s69_s23, [#allocation9]  }
  0x58   :  { %s449_s15 = scalar_lea.hbm %s663_s5, 16 }
  0x59   :  { %p450_p12 = scmp.ne.s32.totalorder %s663_s5, %s449_s15  ;;  %p453_p13 = scmp.lt.u32.totalorder %s449_s15, %s663_s5 }
  0x5b   :  { %p455_p0 = pnand %p453_p13, %p450_p12 }
  0x5d   :  { %458 = shalt.err (!%p455_p0)
}
  0x5e   :  { %s459_s20 = scalar_lea.vmem %s79_s27, 16  ;;  %s463_s1 = scalar_lea.vmem %s79_s27, 32 }
  0x5f   :  { %p460_p1 = scmp.ne.s32.totalorder %s79_s27, %s459_s20  ;;  %p464_p2 = scmp.lt.s32.totalorder %s79_s27, %s79_s27 }
  0x60   :  { %p465_p3 = scmp.lt.s32.totalorder %s463_s1, %s459_s20 }
  0x62   :  { %p466_p4 = por %p465_p3, %p464_p2 }
  0x64   :  { %p467_p5 = pnand %p466_p4, %p460_p1 }
  0x66   :  { %470 = shalt.err (!%p467_p5)
}
  0x67   :  { %81 = dma.hbm_to_vmem [thread:$0]  %s663_s5, 16, %s79_s27, [#allocation12]  }
  0x68   :  { %493 = dma.done.wait [#allocation3], 256  }
  0x69   :  { %494 = vsyncadd [#allocation3], 4294967040 }
  0x6a   :  { %495 = dma.done.wait [#allocation6], 1040  }
  0x6b   :  { %496 = vsyncadd [#allocation6], 4294966256 }
  0x6c   :  { %497 = dma.done.wait [#allocation9], 272  }
  0x6d   :  { %498 = vsyncadd [#allocation9], 4294967024 }
  0x6e   :  { %499 = dma.done.wait [#allocation12], 16  }
  0x6f   :  { %500 = vsyncadd [#allocation12], 4294967280  ;;  %v102_v0 = vld [vmem:[#allocation5] sm:$0xff]  ;;  %v103_v1 = vld [vmem:[#allocation5 + $0x8] sm:$0xff]  ;;  %vm117_vm0 = vcmask 523264   ;;  %vm203_vm1 = vcmask 261120  }
  0x70   :  { %v104_v2 = vld [vmem:[#allocation5 + $0x10] sm:$0xff]  ;;  %v310_v3 = vpack.c.bf16 %v103_v1, %v102_v0  ;;  %v105_v4 = vld [vmem:[#allocation5 + $0x18] sm:$0xff]  ;;  %v106_v6 = vld [vmem:[#allocation5 + $0x20] sm:$0xff]  ;;  %s511_s5 = smov [#allocation13]  }
  0x71   :  { %v314_v5 = vpack.c.bf16 %v105_v4, %v104_v2  ;;  %v107_v7 = vld [vmem:[#allocation5 + $0x28] sm:$0xff]  ;;  %v100_v8 = vld [vmem:[#allocation2] sm:$0xff]  ;;  %v109_v11 = vld [vmem:[#allocation5 + $0x38] sm:$0xff]  ;;  %s261_s21 = sshll.u32 %s511_s5, 4  ;;  %s262_s21 = int_to_ptr.vmem [resolvable:$true] %s261_s21 }
  0x72   :  { %311 = vmatprep.subr.bf16.mxu0 %v310_v3  ;;  %307 = vmatprep.mubr.msk.f32.mxu0 %vm117_vm0, %v100_v8  ;;  %v318_v9 = vpack.c.bf16 %v107_v7, %v106_v6  ;;  %v108_v10 = vld [vmem:[#allocation5 + $0x30] sm:$0xff]  ;;  %v101_v13 = vld [vmem:[#allocation2 + $0x8] sm:$0xff]  ;;  %v276_v14 = vld [vmem:[#allocation7] ss:$0 sm:$0xff]  ;;  %s471_s22 = scalar_lea.vmem %s262_s21, 256  ;;  %p476_p7 = scmp.lt.s32.totalorder %s262_s21, %s262_s21 }
  0x73   :  { %313 = vmatpush3.bf16.msra.mxu0 %v310_v3  ;;  %v322_v12 = vpack.c.bf16 %v109_v11, %v108_v10  ;;  %v200_v17 = vld [vmem:[#allocation8 + $0x8] sm:$0xff]  ;;  %v199_v19 = vld [vmem:[#allocation8] sm:$0xff]  ;;  %v279_v47 = vld [vmem:[#allocation10] ss:$0 sm:$0xff]  ;;  %p472_p6 = scmp.ne.s32.totalorder %s262_s21, %s471_s22  ;;  %p477_p8 = scmp.lt.s32.totalorder %s471_s22, %s471_s22 }
  0x74   :  { %315 = vmatprep.subr.bf16.mxu0 %v314_v5  ;;  %v280_v49 = vld [vmem:[#allocation11] ss:$0 sm:$0xff] }
  0x75   :  { %p478_p9 = por %p477_p8, %p476_p7 }
  0x77   :  { %317 = vmatpush3.bf16.msra.mxu0 %v314_v5  ;;  %p479_p10 = pnand %p478_p9, %p472_p6 }
  0x78   :  { %319 = vmatprep.subr.bf16.mxu0 %v318_v9 }
  0x7b   :  { %321 = vmatpush3.bf16.msra.mxu0 %v318_v9 }
  0x7c   :  { %323 = vmatprep.subr.bf16.mxu0 %v322_v12 }
  0x7f   :  { %325 = vmatpush3.bf16.msra.mxu0 %v322_v12 }
  0x82   :  { %308 = vmatmul.mubr.msk.f32.vlgmr.msra.gmra.mrb[0].mxu0 %vm117_vm0, %v101_v13 }
 0x155   :  { %v309_v15 = vpop.f32.mrb[0].mxu0 }
 0x156   :  { %v196_v16 = vadd.f32 %v309_v15, %v276_v14  ;;  %v190_v18 = vpop.f32.mrb[1].mxu0 }
 0x157   :  { %v191_v20 = vadd.f32 %v276_v14, %v190_v18 }
 0x158   :  { %v202_v21 = vadd.f32 %v200_v17, %v196_v16 }
 0x159   :  { %v201_v22 = vadd.f32 %v199_v19, %v191_v20 }
 0x15a   :  { %v211_v26 = vmul.f32 %v202_v21, %v202_v21  ;;  %v207_v27 = vsel %vm203_vm1, %v202_v21, 0.0 }
 0x15b   :  { %v204_v23 = vsel %vm203_vm1, %v201_v22, 0.0  ;;  %v210_v24 = vmul.f32 %v201_v22, %v201_v22 }
 0x15c   :  { %205 = vadd.xlane.f32.xlu0 %v204_v23  ;;  %v215_v28 = vsel %vm203_vm1, %v211_v26, 0.0 }
 0x15d   :  { %v212_v25 = vsel %vm203_vm1, %v210_v24, 0.0 }
 0x15e   :  { %213 = vadd.xlane.f32.xlu1 %v212_v25 }
 0x160   :  { %208 = vadd.xlane.f32.xlu0 %v207_v27 }
 0x162   :  { %216 = vadd.xlane.f32.xlu1 %v215_v28 }
 0x1e9   :  { %v206_v29 = vpop.xlane.xlu0 %205 }
 0x1ea   :  { %v218_v30 = vmul.f32 0.03125, %v206_v29 }
 0x1eb   :  { %v214_v31 = vpop.xlane.xlu1 %213 }
 0x1ec   :  { %v222_v32 = vmul.f32 %v218_v30, %v218_v30  ;;  %v220_v33 = vmul.f32 0.03125, %v214_v31  ;;  %v228_v45 = vsub.f32 %v201_v22, %v218_v30 }
 0x1ed   :  { %v209_v34 = vpop.xlane.xlu0 %208 }
 0x1ee   :  { %v224_v35 = vsub.f32 %v220_v33, %v222_v32  ;;  %v219_v36 = vmul.f32 0.03125, %v209_v34 }
 0x1ef   :  { %v217_v37 = vpop.xlane.xlu1 %216 }
 0x1f0   :  { %v226_v38 = vmax.f32 %v224_v35, 0.0  ;;  %v223_v39 = vmul.f32 %v219_v36, %v219_v36  ;;  %v221_v40 = vmul.f32 0.03125, %v217_v37  ;;  %v229_v50 = vsub.f32 %v202_v21, %v219_v36 }
 0x1f2   :  { %v230_v41 = vadd.f32 1e-07, %v226_v38  ;;  %v225_v42 = vsub.f32 %v221_v40, %v223_v39 }
 0x1f4   :  { %335 = vrsqrt.f32 %v230_v41  ;;  %v227_v43 = vmax.f32 %v225_v42, 0.0 }
 0x1f6   :  { %v231_v44 = vadd.f32 1e-07, %v227_v43 }
 0x1f8   :  { %337 = vrsqrt.f32 %v231_v44 }
 0x1fe   :  { %v336_v46 = vpop.eup %335 }
 0x1ff   :  { %v234_v48 = vmul.f32 %v336_v46, %v228_v45 }
 0x201   :  { %v243_v51 = vmul.f32 %v279_v47, %v234_v48 }
 0x202   :  { %v338_v52 = vpop.eup %337 }
 0x203   :  { %v235_v53 = vmul.f32 %v338_v52, %v229_v50  ;;  %v252_v54 = vadd.f32 %v280_v49, %v243_v51 }
 0x205   :  { %v244_v55 = vmul.f32 %v279_v47, %v235_v53  ;;  %254 = vst.msk [vmem:[#allocation13] sm:$0xff] %vm203_vm1, %v252_v54 }
 0x207   :  { %v253_v56 = vadd.f32 %v280_v49, %v244_v55 }
 0x209   :  { %255 = vst.msk [vmem:[#allocation13 + $0x8] sm:$0xff] %vm203_vm1, %v253_v56 }
 0x20a   :  { %482 = shalt.err (!%p479_p10)
}
 0x20b   :  { %s483_s27 = scalar_lea.hbm %s664_s6, 256 }
 0x20c   :  { %p484_p11 = scmp.ne.s32.totalorder %s664_s6, %s483_s27  ;;  %p487_p12 = scmp.lt.u32.totalorder %s483_s27, %s664_s6 }
 0x20e   :  { %p489_p13 = pnand %p487_p12, %p484_p11 }
 0x210   :  { %492 = shalt.err (!%p489_p13)
}
 0x211   :  { %267 = dma.vmem_to_hbm [thread:$0]  %s262_s21, 256, %s664_s6, [#allocation4], %s505_s9, %s505_s9, %s506_s10  }
 0x212   :  { %501 = dma.done.wait [#allocation4], 256  }
 0x213   :  { %502 = vsyncadd [#allocation4], 4294967040 }
 0x214   :  { %271 = vsyncpa [#allocation3], 1 }
 0x215   :  { %272 = vsyncpa [#allocation6], 1 }
 0x216   :  { %273 = vsyncpa [#allocation9], 1 }
 0x217   :  { %274 = vsyncpa [#allocation12], 1 }
 0x218   :  { %275 = vsyncpa [#allocation4], 1 }

</bundles_post_ra>
